<compile_context>
chip_gen: v6e
topology: v6e:2x2x1
jax: 0.10.0
libtpu: 0.0.40
codegen_flags: <defaults>
</compile_context>

<pallas_src>
import jax
import jax.numpy as jnp
from jax.experimental import pallas as pl
from jax.experimental.pallas import tpu as pltpu

IN_F = 10        # d1 in_features
HID_F = 100      # d1 out_features / d2 in_features
OUT_F = 5        # d2 out_features
TILE_B_MAX = 4096  # rows per grid step (VMEM per step ~ tile_b*(10+5)*4*2 -> tiny)
MIN_SPLIT = 1024   # force >= 2 grid steps at/above this B (v7x megacore)


def _fused_kernel(x_ref, w1_ref, b1_ref, w2_ref, b2_ref, o_ref):
    # Weights are grid-invariant (constant index_map) -> resident in VMEM.
    # Collapse the two Linears in-kernel (~10K FLOPs, free), then one MXU pass
    # on the batch tile and a VPU bias add. Output block is (tile_b, 5).
    w_c = jnp.dot(w1_ref[...], w2_ref[...],
                  preferred_element_type=jnp.float32)                      # (10, 5)
    b_c = jnp.dot(b1_ref[...], w2_ref[...],
                  preferred_element_type=jnp.float32) + b2_ref[...]        # (1, 5)
    o_ref[...] = (
        jnp.dot(x_ref[...], w_c, preferred_element_type=jnp.float32) + b_c
    ).astype(o_ref.dtype)


def _round_up(n, m):
    return ((n + m - 1) // m) * m


def _choose_tiling(B):
    """Even split of B into n_steps tiles, each a multiple of 8 rows."""
    n_steps = max(pl.cdiv(B, TILE_B_MAX), 1)
    if n_steps == 1 and B >= MIN_SPLIT:
        n_steps = 2  # let v7x's two TensorCores each stream a batch tile
    tile_b = _round_up(pl.cdiv(B, n_steps), 8)
    b_padded = tile_b * n_steps
    return tile_b, b_padded, n_steps


@jax.jit
def model_dense_forward(x, w1, b1, w2, b2):
    """x: (B, 10) f32; w1: (10, 100); b1: (1, 100); w2: (100, 5); b2: (1, 5).

    Returns (B, 5) f32 with the semantics of d2(d1(x)) of the PyTorch module.
    """
    B = x.shape[0]
    dtype = x.dtype

    tile_b, b_padded, n_steps = _choose_tiling(B)
    x_in = x if b_padded == B else jnp.pad(x, ((0, b_padded - B), (0, 0)))

    cost = pl.CostEstimate(
        flops=2 * b_padded * IN_F * OUT_F
        + n_steps * (2 * IN_F * HID_F * OUT_F + 2 * HID_F * OUT_F),
        transcendentals=0,
        bytes_accessed=4 * (b_padded * IN_F + IN_F * HID_F + HID_F
                            + HID_F * OUT_F + OUT_F + b_padded * OUT_F),
    )

    out_padded = pl.pallas_call(
        _fused_kernel,
        out_shape=jax.ShapeDtypeStruct((b_padded, OUT_F), dtype),
        grid=(n_steps,),
        in_specs=[
            # x: streamed along the batch axis; 10 == full last dim.
            pl.BlockSpec((tile_b, IN_F), lambda i: (i, 0)),
            # raw weights / biases: full arrays, resident across all grid steps.
            pl.BlockSpec((IN_F, HID_F), lambda i: (0, 0)),
            pl.BlockSpec((1, HID_F), lambda i: (0, 0)),
            pl.BlockSpec((HID_F, OUT_F), lambda i: (0, 0)),
            pl.BlockSpec((1, OUT_F), lambda i: (0, 0)),
        ],
        # Narrow output block: 5 == full last dim -> no 25x write inflation,
        # no wrapper lane-slice.
        out_specs=pl.BlockSpec((tile_b, OUT_F), lambda i: (i, 0)),
        compiler_params=pltpu.CompilerParams(
            dimension_semantics=("parallel",),  # megacore sharding on v7x
        ),
        cost_estimate=cost,
    )(x_in, w1, b1, w2, b2)

    return out_padded if b_padded == B else out_padded[:B]


def init_params(key):
    """Deterministic init mimicking nn.Linear's U(-1/sqrt(fan_in), 1/sqrt(fan_in))."""
    k1, k2, k3, k4 = jax.random.split(key, 4)
    bound1 = 1.0 / jnp.sqrt(IN_F)
    bound2 = 1.0 / jnp.sqrt(HID_F)
    # Stored as (in, out) = W.T relative to PyTorch's (out, in).
    w1 = jax.random.uniform(k1, (IN_F, HID_F), jnp.float32, -bound1, bound1)
    b1 = jax.random.uniform(k2, (1, HID_F), jnp.float32, -bound1, bound1)
    w2 = jax.random.uniform(k3, (HID_F, OUT_F), jnp.float32, -bound2, bound2)
    b2 = jax.random.uniform(k4, (1, OUT_F), jnp.float32, -bound2, bound2)
    return w1, b1, w2, b2


if __name__ == "__main__":
    key = jax.random.PRNGKey(0)
    kx, kp = jax.random.split(key)

    B = 8
    x = jax.random.normal(kx, (B, IN_F), jnp.float32)  # batch['input']
    w1, b1, w2, b2 = init_params(kp)

    out = model_dense_forward(x, w1, b1, w2, b2)
    out = jax.block_until_ready(out)

    # Pure-JAX reference of the original two-layer forward.
    ref = (x @ w1 + b1) @ w2 + b2
    assert out.shape == (B, OUT_F)
    assert jnp.allclose(out, ref, atol=1e-4, rtol=1e-4), (
        f"max abs err {jnp.max(jnp.abs(out - ref))}"
    )

    print("KERNEL_OK")
</pallas_src>

<mosaic_0001>
module attributes {stable_mosaic.version = 11 : i64} {
  func.func @_fused_kernel(%arg0: i32, %arg1: memref<8x10xf32, #tpu.memory_space<vmem>>, %arg2: memref<10x100xf32, #tpu.memory_space<vmem>>, %arg3: memref<1x100xf32, #tpu.memory_space<vmem>>, %arg4: memref<100x5xf32, #tpu.memory_space<vmem>>, %arg5: memref<1x5xf32, #tpu.memory_space<vmem>>, %arg6: memref<8x5xf32, #tpu.memory_space<vmem>>) attributes {dimension_semantics = [#tpu.dimension_semantics<parallel>], iteration_bounds = array<i64: 1>, scalar_prefetch = 0 : i64, scratch_operands = 0 : i64, tpu.core_type = #tpu.core_type<tc>, window_params = [{transform_indices = @transform_0, window_bounds = array<i64: 8, 10>}, {pipeline_mode = #tpu.pipeline_mode<synchronous>, transform_indices = @transform_1, window_bounds = array<i64: 10, 100>}, {pipeline_mode = #tpu.pipeline_mode<synchronous>, transform_indices = @transform_2, window_bounds = array<i64: 1, 100>}, {pipeline_mode = #tpu.pipeline_mode<synchronous>, transform_indices = @transform_3, window_bounds = array<i64: 100, 5>}, {pipeline_mode = #tpu.pipeline_mode<synchronous>, transform_indices = @transform_4, window_bounds = array<i64: 1, 5>}, {transform_indices = @transform_5, window_bounds = array<i64: 8, 5>}]} {
    %c0 = arith.constant 0 : index
    %c0_0 = arith.constant 0 : index
    %0 = vector.load %arg2[%c0, %c0_0] : memref<10x100xf32, #tpu.memory_space<vmem>>, vector<10x100xf32>
    %c0_1 = arith.constant 0 : index
    %c0_2 = arith.constant 0 : index
    %1 = vector.load %arg4[%c0_1, %c0_2] : memref<100x5xf32, #tpu.memory_space<vmem>>, vector<100x5xf32>
    %cst = arith.constant dense<0.000000e+00> : vector<10x5xf32>
    %2 = tpu.matmul %0, %1, %cst {dimension_numbers = #tpu.dot_dimension_numbers<[1], [0], [0], [1], [0, 0, 1, 1], [], []>} : vector<10x100xf32>, vector<100x5xf32>, vector<10x5xf32> -> vector<10x5xf32>
    %c0_3 = arith.constant 0 : index
    %c0_4 = arith.constant 0 : index
    %3 = vector.load %arg3[%c0_3, %c0_4] : memref<1x100xf32, #tpu.memory_space<vmem>>, vector<1x100xf32>
    %c0_5 = arith.constant 0 : index
    %c0_6 = arith.constant 0 : index
    %4 = vector.load %arg4[%c0_5, %c0_6] : memref<100x5xf32, #tpu.memory_space<vmem>>, vector<100x5xf32>
    %cst_7 = arith.constant dense<0.000000e+00> : vector<1x5xf32>
    %5 = tpu.matmul %3, %4, %cst_7 {dimension_numbers = #tpu.dot_dimension_numbers<[1], [0], [0], [1], [0, 0, 1, 1], [], []>} : vector<1x100xf32>, vector<100x5xf32>, vector<1x5xf32> -> vector<1x5xf32>
    %c0_8 = arith.constant 0 : index
    %c0_9 = arith.constant 0 : index
    %6 = vector.load %arg5[%c0_8, %c0_9] : memref<1x5xf32, #tpu.memory_space<vmem>>, vector<1x5xf32>
    %7 = arith.addf %5, %6 : vector<1x5xf32>
    %c0_10 = arith.constant 0 : index
    %c0_11 = arith.constant 0 : index
    %8 = vector.load %arg1[%c0_10, %c0_11] : memref<8x10xf32, #tpu.memory_space<vmem>>, vector<8x10xf32>
    %cst_12 = arith.constant dense<0.000000e+00> : vector<8x5xf32>
    %9 = tpu.matmul %8, %2, %cst_12 {dimension_numbers = #tpu.dot_dimension_numbers<[1], [0], [0], [1], [0, 0, 1, 1], [], []>} : vector<8x10xf32>, vector<10x5xf32>, vector<8x5xf32> -> vector<8x5xf32>
    %10 = vector.broadcast %7 : vector<1x5xf32> to vector<8x5xf32>
    %11 = arith.addf %9, %10 : vector<8x5xf32>
    %c0_13 = arith.constant 0 : index
    %c0_14 = arith.constant 0 : index
    %12 = vector.load %arg6[%c0_13, %c0_14] : memref<8x5xf32, #tpu.memory_space<vmem>>, vector<8x5xf32>
    tpu.vector_store %arg6[%c0_13, %c0_14], %11 {strides = array<i32>} : memref<8x5xf32, #tpu.memory_space<vmem>>, vector<8x5xf32>,
    return
  }
  func.func @transform_0(%arg0: i32) -> (i32, i32) {
    %c0_i32 = arith.constant 0 : i32
    %c0_i32_0 = arith.constant 0 : i32
    return %arg0, %c0_i32 : i32, i32
  }
  func.func @transform_1(%arg0: i32) -> (i32, i32) {
    %c0_i32 = arith.constant 0 : i32
    %c0_i32_0 = arith.constant 0 : i32
    %c0_i32_1 = arith.constant 0 : i32
    return %c0_i32, %c0_i32_0 : i32, i32
  }
  func.func @transform_2(%arg0: i32) -> (i32, i32) {
    %c0_i32 = arith.constant 0 : i32
    %c0_i32_0 = arith.constant 0 : i32
    %c0_i32_1 = arith.constant 0 : i32
    return %c0_i32, %c0_i32_0 : i32, i32
  }
  func.func @transform_3(%arg0: i32) -> (i32, i32) {
    %c0_i32 = arith.constant 0 : i32
    %c0_i32_0 = arith.constant 0 : i32
    %c0_i32_1 = arith.constant 0 : i32
    return %c0_i32, %c0_i32_0 : i32, i32
  }
  func.func @transform_4(%arg0: i32) -> (i32, i32) {
    %c0_i32 = arith.constant 0 : i32
    %c0_i32_0 = arith.constant 0 : i32
    %c0_i32_1 = arith.constant 0 : i32
    return %c0_i32, %c0_i32_0 : i32, i32
  }
  func.func @transform_5(%arg0: i32) -> (i32, i32) {
    %c0_i32 = arith.constant 0 : i32
    %c0_i32_0 = arith.constant 0 : i32
    return %arg0, %c0_i32 : i32, i32
  }
}

</mosaic_0001>

<bundles_post_ra>
// kernel: model_dense_forward.1
= control target key start
LH: loop header
LB: loop body
LE: loop exit
PB: predicated region body
PF: predicated region fallthrough
CT: control target
= control target key end

     0   :  { %vm43_vm0 = vcmask 1043456   ;;  %vm36_vm1 = vcmask 818176   ;;  %v425_v3 = vmov 0.0   ;;  %s535_s0 = inlined_call_operand.vmem [shape: f32[8,10], index: 0, kind: input, shape index: {}]   ;;  %s536_s1 = inlined_call_operand.vmem [shape: f32[10,100], index: 1, kind: input, shape index: {}]   ;;  %s537_s2 = inlined_call_operand.vmem [shape: f32[1,100], index: 2, kind: input, shape index: {}]   ;;  %s538_s3 = inlined_call_operand.vmem [shape: f32[100,5], index: 3, kind: input, shape index: {}]   ;;  %s539_s4 = inlined_call_operand.vmem [shape: f32[1,5], index: 4, kind: input, shape index: {}]   ;;  %s540_s5 = inlined_call_operand.hbm [shape: f32[8,5], index: 5, kind: output, shape index: {}]  }
   0x1   :  { %v35_v0 = vld [vmem:[%s538_s3 + $0x60] sm:$0xf]  ;;  %v34_v1 = vld [vmem:[%s538_s3 + $0x58] sm:$0xff]  ;;  %v33_v2 = vld [vmem:[%s538_s3 + $0x50] sm:$0xff]  ;;  %364 = vmatprep.subr.mxu1 %v425_v3 }
   0x2   :  { %335 = vmatprep.subr.msk.mxu0 %vm43_vm0, %v35_v0  ;;  %365 = vmatpush3.msk.msra.mxu1 %vm43_vm0, %v35_v0  ;;  %v32_v4 = vld [vmem:[%s538_s3 + $0x48] sm:$0xff]  ;;  %v21_v5 = vld [vmem:[%s536_s1] sm:$0xff] }
   0x3   :  { %336 = vmatpush3.msk.msra.mxu0 %vm43_vm0, %v35_v0  ;;  %366 = vmatprep.subr.mxu1 %v425_v3 }
   0x4   :  { %337 = vmatprep.subr.mxu0 %v34_v1  ;;  %361 = vmatprep.mubr.msk.f32.mxu0 %vm36_vm1, %v21_v5 }
   0x5   :  { %338 = vmatpush3.msra.mxu0 %v34_v1 }
   0x6   :  { %339 = vmatprep.subr.mxu0 %v33_v2 }
   0x7   :  { %10 = vsyncpa [#allocation3], 0  ;;  %340 = vmatpush3.msra.mxu0 %v33_v2  ;;  %v31_v6 = vld [vmem:[%s538_s3 + $0x40] sm:$0xff]  ;;  %367 = vmatpush3.msra.mxu1 %v34_v1  ;;  %v30_v7 = vld [vmem:[%s538_s3 + $0x38] sm:$0xff]  ;;  %vm426_vm2 = vmmov 0   ;;  %vm206_vm3 = vcmask 1041408   ;;  %v198_v22 = vlaneseq }
   0x8   :  { %341 = vmatprep.subr.mxu0 %v32_v4  ;;  %368 = vmatprep.subr.mxu1 %v425_v3  ;;  %v29_v8 = vld [vmem:[%s538_s3 + $0x30] sm:$0xff]  ;;  %v28_v9 = vld [vmem:[%s538_s3 + $0x28] sm:$0xff]  ;;  %v27_v10 = vld [vmem:[%s538_s3 + $0x20] sm:$0xff]  ;;  %vm202_vm4 = vcmask 80896   ;;  %s427_s26 = smov [#allocation2]   ;;  %vm280_vm5 = vcmask 39936  }
   0x9   :  { %342 = vmatpush3.msra.mxu0 %v32_v4  ;;  %369 = vmatpush3.msra.mxu1 %v33_v2  ;;  %v26_v11 = vld [vmem:[%s538_s3 + $0x18] sm:$0xff]  ;;  %v25_v12 = vld [vmem:[%s538_s3 + $0x10] sm:$0xff]  ;;  %v24_v13 = vld [vmem:[%s538_s3 + $0x8] sm:$0xff]  ;;  %v199_v23 = vshrl.u32 %v198_v22, 7  ;;  %s288_s27 = sshll.u32 %s427_s26, 4  ;;  %s289_s27 = int_to_ptr.vmem [resolvable:$true] %s288_s27 }
   0xa   :  { %343 = vmatprep.subr.mxu0 %v31_v6  ;;  %370 = vmatprep.subr.mxu1 %v425_v3  ;;  %v23_v14 = vld [vmem:[%s538_s3] sm:$0xff]  ;;  %v22_v15 = vld [vmem:[%s536_s1 + $0x8] sm:$0x3]  ;;  %p408_p1 = scmp.lt.s32.totalorder %s289_s27, %s289_s27 }
   0xb   :  { %344 = vmatpush3.msra.mxu0 %v31_v6  ;;  %371 = vmatpush3.msra.mxu1 %v32_v4  ;;  %v122_v16 = vld [vmem:[%s537_s2] sm:$0x1]  ;;  %v200_v26 = vsub.s32 0, %v199_v23 }
   0xc   :  { %345 = vmatprep.subr.mxu0 %v30_v7  ;;  %372 = vmatprep.subr.mxu1 %v425_v3  ;;  %v197_v18 = vld [vmem:[%s535_s0] sm:$0xff]  ;;  %s403_s0 = scalar_lea.vmem %s289_s27, 128 }
   0xd   :  { %346 = vmatpush3.msra.mxu0 %v30_v7  ;;  %373 = vmatpush3.msra.mxu1 %v31_v6  ;;  %v123_v24 = vld [vmem:[%s539_s4] sm:$0x1]  ;;  %p404_p0 = scmp.ne.s32.totalorder %s289_s27, %s403_s0  ;;  %p409_p2 = scmp.lt.s32.totalorder %s403_s0, %s403_s0 }
   0xe   :  { %347 = vmatprep.subr.mxu0 %v29_v8  ;;  %374 = vmatprep.subr.mxu1 %v425_v3 }
   0xf   :  { %348 = vmatpush3.msra.mxu0 %v29_v8  ;;  %375 = vmatpush3.msra.mxu1 %v30_v7  ;;  %p410_p3 = por %p409_p2, %p408_p1 }
  0x10   :  { %349 = vmatprep.subr.mxu0 %v28_v9  ;;  %376 = vmatprep.subr.mxu1 %v425_v3 }
  0x11   :  { %350 = vmatpush3.msra.mxu0 %v28_v9  ;;  %377 = vmatpush3.msra.mxu1 %v29_v8  ;;  %p411_p4 = pnand %p410_p3, %p404_p0 }
  0x12   :  { %351 = vmatprep.subr.mxu0 %v27_v10  ;;  %378 = vmatprep.subr.mxu1 %v425_v3 }
  0x13   :  { %352 = vmatpush3.msra.mxu0 %v27_v10  ;;  %379 = vmatpush3.msra.mxu1 %v28_v9 }
  0x14   :  { %353 = vmatprep.subr.mxu0 %v26_v11  ;;  %380 = vmatprep.subr.mxu1 %v425_v3 }
  0x15   :  { %354 = vmatpush3.msra.mxu0 %v26_v11  ;;  %381 = vmatpush3.msra.mxu1 %v27_v10 }
  0x16   :  { %355 = vmatprep.subr.mxu0 %v25_v12  ;;  %382 = vmatprep.subr.mxu1 %v425_v3 }
  0x17   :  { %356 = vmatpush3.msra.mxu0 %v25_v12  ;;  %383 = vmatpush3.msra.mxu1 %v26_v11 }
  0x18   :  { %357 = vmatprep.subr.mxu0 %v24_v13  ;;  %384 = vmatprep.subr.mxu1 %v425_v3 }
  0x19   :  { %358 = vmatpush3.msra.mxu0 %v24_v13  ;;  %385 = vmatpush3.msra.mxu1 %v25_v12 }
  0x1a   :  { %359 = vmatprep.subr.mxu0 %v23_v14  ;;  %386 = vmatprep.subr.mxu1 %v425_v3 }
  0x1b   :  { %360 = vmatpush3.msra.mxu0 %v23_v14  ;;  %387 = vmatpush3.msra.mxu1 %v24_v13 }
  0x1c   :  { %362 = vmatmul.mubr.msk.f32.vlgmr.msra.gmra.mxu0 %vm36_vm1, %v22_v15  ;;  %388 = vmatprep.subr.mxu1 %v425_v3 }
  0x1d   :  { %389 = vmatpush3.msra.mxu1 %v23_v14  ;;  %390 = vmatprep.mubr.msk.f32.mxu1 %vm426_vm2, %v425_v3 }
  0x1e   :  { %391 = vmatmul.mubr.msk.f32.vlgmr.msra.gmra.mxu1 %vm36_vm1, %v122_v16  ;;  %393 = vmatprep.subr.mxu0 %v425_v3 }
  0x1f   :  { %397 = vmatprep.mubr.msk.f32.mxu0 %vm426_vm2, %v425_v3 }
  0xdc   :  { %v363_v17 = vpop.f32.mrf.mxu0 }
  0xdd   :  { %394 = vmatpush3.msk.msra.mxu0 %vm206_vm3, %v363_v17 }
  0xde   :  { %v113_v19 = vpop.f32.mrf.mxu0  ;;  %395 = vmatprep.subr.mxu0 %v425_v3  ;;  %v193_v20 = vpop.f32.mrf.mxu1 }
  0xdf   :  { %396 = vmatpush3.msra.mxu0 %v113_v19  ;;  %v194_v25 = vadd.f32 %v193_v20, %v123_v24 }
  0xe0   :  { %398 = vmatmul.mubr.msk.f32.vlgmr.msra.gmra.mxu0 %vm202_vm4, %v197_v18  ;;  %v392_v21 = vpop.f32.mrf.mxu1 }
  0xe1   :  { %v201_v27 = vrot.slane %v194_v25, %v200_v26 }
 0x1a0   :  { %v276_v28 = vpop.f32.mrf.mxu0 }
 0x1a1   :  { %v277_v29 = vadd.f32 %v276_v28, %v201_v27 }
 0x1a2   :  { %v399_v30 = vpop.f32.mrf.mxu0 }
 0x1a3   :  { %281 = vst.msk [vmem:[#allocation2] sm:$0xff] %vm280_vm5, %v277_v29 }
 0x1a4   :  { %414 = shalt.err (!%p411_p4)
}
 0x1a5   :  { %291 = dma.vmem_to_hbm [thread:$0]  %s289_s27, 128, %s540_s5, [#allocation3]  }
 0x1a6   :  { %423 = dma.done.wait [#allocation3], 128  }
 0x1a7   :  { %424 = vsyncadd [#allocation3], 4294967168 }
 0x1a8   :  { %295 = vsyncpa [#allocation3], 1 }

</bundles_post_ra>
